<compile_context>
chip_gen: v6e
topology: v6e:2x2x1
jax: 0.10.0
libtpu: 0.0.40
codegen_flags: <defaults>
</compile_context>

<pallas_src>
import math
from functools import partial

import jax
import jax.numpy as jnp
from jax.experimental import pallas as pl
from jax.experimental.pallas import tpu as pltpu

KSIZE = 3
PAD = 1
EPS = 1e-5  # PyTorch GroupNorm default eps


def _num_groups_for(channels: int) -> int:
    return min(32, channels // 4) if channels >= 4 else 1


# ----------------------------- in-kernel helpers -----------------------------

def _erf(x):
    # Abramowitz & Stegun 7.1.26 polynomial, |err| <= 1.5e-7 — reproduces the
    # exact (erf-based) nn.GELU().  The divide is replaced by pl.reciprocal
    # (exact flavour, keeps the 1e-3 parity; approx=True would ride the EUP).
    p = 0.3275911
    a1, a2, a3, a4, a5 = 0.254829592, -0.284496736, 1.421413741, -1.453152027, 1.061405429
    sgn = jnp.where(x >= 0.0, 1.0, -1.0)
    ax = jnp.abs(x)
    t = pl.reciprocal(1.0 + p * ax, approx=False)
    poly = t * (a1 + t * (a2 + t * (a3 + t * (a4 + t * a5))))
    return sgn * (1.0 - poly * jnp.exp(-ax * ax))


def _gelu_exact(x):
    return 0.5 * x * (1.0 + _erf(x * (1.0 / math.sqrt(2.0))))


def _group_norm_rows(y, member, gamma, beta, n_spatial):
    # Single-pass GroupNorm on (C, N) rows (channels on sublanes, spatial on lanes).
    # One sweep computes sum and sum-of-squares; var = E[x^2] - mean^2; the affine
    # is folded into one per-channel (scale, shift) FMA.  member: (C, G) one-hot.
    C = y.shape[0]
    G = member.shape[1]
    inv_cnt = 1.0 / float((C // G) * n_spatial)

    s1 = jnp.sum(y, axis=1, keepdims=True)                            # (C,1)
    s2 = jnp.sum(y * y, axis=1, keepdims=True)                        # (C,1)
    gmean = jnp.sum(s1 * member, axis=0, keepdims=True) * inv_cnt     # (1,G)
    gms = jnp.sum(s2 * member, axis=0, keepdims=True) * inv_cnt       # (1,G)
    ginv = jax.lax.rsqrt(gms - gmean * gmean + EPS)                   # (1,G)

    mean = jnp.sum(member * gmean, axis=1, keepdims=True)             # (C,1)
    inv = jnp.sum(member * ginv, axis=1, keepdims=True)               # (C,1)
    scale = inv * gamma                                               # (C,1)
    shift = beta - mean * scale                                       # (C,1)
    return y * scale + shift


# --------------------------------- the kernel --------------------------------

def _dwblock_kernel(x_ref, mask_ref, wdw_ref, m1_ref, g1_ref, b1_ref,
                    wpw_ref, m2_ref, g2_ref, b2_ref, o_ref, *,
                    W, hw_valid, padded, bf16_mxu):
    C, HWp = x_ref.shape
    x = x_ref[...].astype(jnp.float32)               # (C, HWp), lanes fully dense

    # hoisted: per-tap depthwise weights (C,1) and the 4 border masks (1,HWp)
    w = [[wdw_ref[dh * KSIZE + dw] for dw in range(KSIZE)] for dh in range(KSIZE)]
    m_top, m_bot, m_left, m_right = (mask_ref[i] for i in range(4))

    # ---- separable depthwise 3x3 (stride 1): 4 rolls + 4 masks + 9 MACs ----
    # row halo (dh = -1 / +1): lane rotations on the XLU, row-border masks here
    r_up = pltpu.roll(x, shift=W, axis=1) * m_top                 # x[p - W]
    r_dn = pltpu.roll(x, shift=(-W) % HWp, axis=1) * m_bot        # x[p + W]

    # weighted row sums for each column tap dw in {-1, 0, +1} (9 VPU MACs)
    p_m1 = r_up * w[0][0] + x * w[1][0] + r_dn * w[2][0]
    p_0 = r_up * w[0][1] + x * w[1][1] + r_dn * w[2][1]
    p_p1 = r_up * w[0][2] + x * w[1][2] + r_dn * w[2][2]

    # column halo (dw = -1 / +1): 2 more rolls + column-border masks
    acc = (p_0
           + pltpu.roll(p_m1, shift=1, axis=1) * m_left
           + pltpu.roll(p_p1, shift=HWp - 1, axis=1) * m_right)

    # ---- dw_norm (GroupNorm, single stats pass) + exact GELU ----
    y = _gelu_exact(_group_norm_rows(acc, m1_ref[...], g1_ref[...], b1_ref[...], hw_valid))
    if padded:
        y = y * mask_ref[4]   # zero the lane-padding tail so GN2 stats stay clean

    # ---- project 1x1 conv on the MXU: (OC,C)@(C,HWp) -> lane-dense (OC,HWp) ----
    if bf16_mxu:   # only when the surrounding model runs in bf16
        z = jnp.dot(wpw_ref[...].astype(jnp.bfloat16), y.astype(jnp.bfloat16),
                    preferred_element_type=jnp.float32)
    else:
        z = jnp.dot(wpw_ref[...], y, preferred_element_type=jnp.float32)

    # ---- project_conv GroupNorm (activation='none') ----
    z = _group_norm_rows(z, m2_ref[...], g2_ref[...], b2_ref[...], hw_valid)
    o_ref[...] = z.astype(o_ref.dtype)               # unmasked, lane-dense stores


# --------------------------------- wrapper -----------------------------------

def depthwise_conv_block(x_nchw, params):
    wdw, g1, b1, wpw, g2, b2 = params  # torch shapes: (C,3,3),(C,),(C,),(OC,C),(OC,),(OC,)
    B, C, H, W = x_nchw.shape
    OC = wpw.shape[0]
    HW = H * W
    HWp = ((HW + 127) // 128) * 128    # lane-dense padding when unaligned
    padded = HWp != HW

    g1n = _num_groups_for(C)
    g2n = _num_groups_for(OC)
    if C % g1n or OC % g2n:            # PyTorch GroupNorm would raise
        raise ValueError("channels must be divisible by the GroupNorm group count")

    io_dtype = x_nchw.dtype            # keep HBM I/O in the model's dtype (bf16 stays bf16)
    bf16_mxu = io_dtype == jnp.bfloat16

    # NCHW -> (B, C, H*W): pure reshape; pad the lane axis only when unaligned.
    x_flat = x_nchw.reshape(B, C, HW)
    if padded:
        x_flat = jnp.pad(x_flat, ((0, 0), (0, 0), (0, HWp - HW)))

    f32 = jnp.float32
    wdw_k = jnp.transpose(wdw.reshape(C, KSIZE * KSIZE), (1, 0)) \
               .reshape(KSIZE * KSIZE, C, 1).astype(f32)                 # (9, C, 1)
    wpw_k = wpw.astype(f32)                                              # (OC, C)
    g1_k, b1_k = g1.reshape(C, 1).astype(f32), b1.reshape(C, 1).astype(f32)
    g2_k, b2_k = g2.reshape(OC, 1).astype(f32), b2.reshape(OC, 1).astype(f32)

    # 2 row-border + 2 column-border masks (+1 lane-valid mask for padded tails)
    idx = jnp.arange(HWp)
    row, col = idx // W, idx % W
    in_img = row < H
    mask_k = jnp.stack([
        (row >= 1) & in_img,       # dh = -1 valid
        row <= H - 2,              # dh = +1 valid
        (col >= 1) & in_img,       # dw = -1 valid
        (col <= W - 2) & in_img,   # dw = +1 valid
        in_img,                    # lane-valid (padding tail)
    ]).reshape(5, 1, HWp).astype(f32)

    # one-hot group-membership matrices for the two GroupNorms
    m1_k = (jnp.arange(C)[:, None] // (C // g1n) == jnp.arange(g1n)[None, :]).astype(f32)
    m2_k = (jnp.arange(OC)[:, None] // (OC // g2n) == jnp.arange(g2n)[None, :]).astype(f32)

    # shape-derived VMEM request with headroom (don't ask for all of v7x's 64 MiB)
    itemsize = jnp.dtype(io_dtype).itemsize
    io_bytes = 2 * (C + OC) * HWp * itemsize          # double-buffered in/out tiles
    work_bytes = (8 * C + 3 * OC) * HWp * 4           # f32 working set (rough)
    vmem_limit = int(min(100 * 2 ** 20, max(4 * 2 ** 20, 2 * (io_bytes + work_bytes))))

    cost = pl.CostEstimate(
        flops=int(B * HWp * (2 * 9 * C + 8 * C + 2 * C * OC + 10 * (C + OC) + 16 * C)),
        transcendentals=int(B * HWp * C),
        bytes_accessed=int(itemsize * B * (C + OC) * HWp
                           + 4 * (5 * HWp + 9 * C + OC * C + 2 * C + 2 * OC)),
    )

    out = pl.pallas_call(
        partial(_dwblock_kernel, W=W, hw_valid=HW, padded=padded, bf16_mxu=bf16_mxu),
        out_shape=jax.ShapeDtypeStruct((B, OC, HWp), io_dtype),
        grid=(B,),
        in_specs=[
            pl.BlockSpec((None, C, HWp), lambda b: (b, 0, 0)),             # activations
            pl.BlockSpec((5, 1, HWp), lambda b: (0, 0, 0)),                # border/valid masks
            pl.BlockSpec((KSIZE * KSIZE, C, 1), lambda b: (0, 0, 0)),      # depthwise taps
            pl.BlockSpec((C, g1n), lambda b: (0, 0)),                      # GN1 one-hot groups
            pl.BlockSpec((C, 1), lambda b: (0, 0)),                        # gamma1
            pl.BlockSpec((C, 1), lambda b: (0, 0)),                        # beta1
            pl.BlockSpec((OC, C), lambda b: (0, 0)),                       # 1x1 weights
            pl.BlockSpec((OC, g2n), lambda b: (0, 0)),                     # GN2 one-hot groups
            pl.BlockSpec((OC, 1), lambda b: (0, 0)),                       # gamma2
            pl.BlockSpec((OC, 1), lambda b: (0, 0)),                       # beta2
        ],
        out_specs=pl.BlockSpec((None, OC, HWp), lambda b: (b, 0, 0)),      # lane-dense output
        compiler_params=pltpu.CompilerParams(
            dimension_semantics=("parallel",),        # batch samples are independent
            vmem_limit_bytes=vmem_limit),
        cost_estimate=cost,
    )(x_flat, mask_k, wdw_k, m1_k, g1_k, b1_k, wpw_k, m2_k, g2_k, b2_k)

    if padded:
        out = out[:, :, :HW]
    return out.reshape(B, OC, H, W)    # free reshape; no post-kernel HBM transpose


# --------------------------- pure-JAX reference check -------------------------

def _group_norm_ref(x, G, gamma, beta):
    B, C, H, W = x.shape
    xg = x.reshape(B, G, C // G, H, W)
    mean = jnp.mean(xg, axis=(2, 3, 4), keepdims=True)
    var = jnp.var(xg, axis=(2, 3, 4), keepdims=True)
    xn = ((xg - mean) * jax.lax.rsqrt(var + EPS)).reshape(B, C, H, W)
    return xn * gamma.reshape(1, C, 1, 1) + beta.reshape(1, C, 1, 1)


def reference(x, params):
    wdw, g1, b1, wpw, g2, b2 = params
    B, C, H, W = x.shape
    OC = wpw.shape[0]
    y = jax.lax.conv_general_dilated(
        x, wdw.reshape(C, 1, KSIZE, KSIZE), (1, 1), ((PAD, PAD), (PAD, PAD)),
        dimension_numbers=("NCHW", "OIHW", "NCHW"), feature_group_count=C,
        precision=jax.lax.Precision.HIGHEST)
    y = _group_norm_ref(y, _num_groups_for(C), g1, b1)
    y = jax.nn.gelu(y, approximate=False)
    z = jax.lax.conv_general_dilated(
        y, wpw.reshape(OC, C, 1, 1), (1, 1), "VALID",
        dimension_numbers=("NCHW", "OIHW", "NCHW"),
        precision=jax.lax.Precision.HIGHEST)
    z = _group_norm_ref(z, _num_groups_for(OC), g2, b2)
    return z


if __name__ == "__main__":
    def run_case(key, B, C, H, W, OC):
        k = jax.random.split(key, 7)
        x = jax.random.normal(k[0], (B, C, H, W), jnp.float32)
        wdw = jax.random.normal(k[1], (C, KSIZE, KSIZE), jnp.float32) * (1.0 / 3.0)
        wpw = jax.random.normal(k[2], (OC, C), jnp.float32) * (1.0 / math.sqrt(C))
        g1 = 1.0 + 0.1 * jax.random.normal(k[3], (C,), jnp.float32)
        b1 = 0.1 * jax.random.normal(k[4], (C,), jnp.float32)
        g2 = 1.0 + 0.1 * jax.random.normal(k[5], (OC,), jnp.float32)
        b2 = 0.1 * jax.random.normal(k[6], (OC,), jnp.float32)
        params = (wdw, g1, b1, wpw, g2, b2)

        out = jax.block_until_ready(depthwise_conv_block(x, params))
        ref = jax.block_until_ready(reference(x, params))
        assert out.shape == ref.shape == (B, OC, H, W), (out.shape, ref.shape)
        err = float(jnp.max(jnp.abs(out - ref)))
        assert err < 1e-3, f"max abs err {err}"

    root = jax.random.PRNGKey(0)
    k0, k1 = jax.random.split(root)
    run_case(k0, B=2, C=4, H=16, W=16, OC=8)    # lane-aligned path (HW = 256)
    run_case(k1, B=1, C=8, H=12, W=13, OC=4)    # unaligned HW -> padded lane path
    print("KERNEL_OK")
</pallas_src>

<mosaic_0001>
module attributes {stable_mosaic.version = 11 : i64} {
  func.func @_dwblock_kernel(%arg0: i32, %arg1: memref<1x4x256xf32, #tpu.memory_space<vmem>>, %arg2: memref<5x1x256xf32, #tpu.memory_space<vmem>>, %arg3: memref<9x4x1xf32, #tpu.memory_space<vmem>>, %arg4: memref<4x1xf32, #tpu.memory_space<vmem>>, %arg5: memref<4x1xf32, #tpu.memory_space<vmem>>, %arg6: memref<4x1xf32, #tpu.memory_space<vmem>>, %arg7: memref<8x4xf32, #tpu.memory_space<vmem>>, %arg8: memref<8x2xf32, #tpu.memory_space<vmem>>, %arg9: memref<8x1xf32, #tpu.memory_space<vmem>>, %arg10: memref<8x1xf32, #tpu.memory_space<vmem>>, %arg11: memref<1x8x256xf32, #tpu.memory_space<vmem>>) attributes {dimension_semantics = [#tpu.dimension_semantics<parallel>], iteration_bounds = array<i64: 2>, scalar_prefetch = 0 : i64, scratch_operands = 0 : i64, tpu.core_type = #tpu.core_type<tc>, window_params = [{transform_indices = @transform_0, window_bounds = array<i64: 1, 4, 256>}, {pipeline_mode = #tpu.pipeline_mode<synchronous>, transform_indices = @transform_1, window_bounds = array<i64: 5, 1, 256>}, {pipeline_mode = #tpu.pipeline_mode<synchronous>, transform_indices = @transform_2, window_bounds = array<i64: 9, 4, 1>}, {pipeline_mode = #tpu.pipeline_mode<synchronous>, transform_indices = @transform_3, window_bounds = array<i64: 4, 1>}, {pipeline_mode = #tpu.pipeline_mode<synchronous>, transform_indices = @transform_4, window_bounds = array<i64: 4, 1>}, {pipeline_mode = #tpu.pipeline_mode<synchronous>, transform_indices = @transform_5, window_bounds = array<i64: 4, 1>}, {pipeline_mode = #tpu.pipeline_mode<synchronous>, transform_indices = @transform_6, window_bounds = array<i64: 8, 4>}, {pipeline_mode = #tpu.pipeline_mode<synchronous>, transform_indices = @transform_7, window_bounds = array<i64: 8, 2>}, {pipeline_mode = #tpu.pipeline_mode<synchronous>, transform_indices = @transform_8, window_bounds = array<i64: 8, 1>}, {pipeline_mode = #tpu.pipeline_mode<synchronous>, transform_indices = @transform_9, window_bounds = array<i64: 8, 1>}, {transform_indices = @transform_10, window_bounds = array<i64: 1, 8, 256>}]} {
    %c0 = arith.constant 0 : index
    %c0_0 = arith.constant 0 : index
    %c0_1 = arith.constant 0 : index
    %0 = vector.load %arg1[%c0, %c0_0, %c0_1] : memref<1x4x256xf32, #tpu.memory_space<vmem>>, vector<1x4x256xf32>
    %1 = vector.shape_cast %0 : vector<1x4x256xf32> to vector<4x256xf32>
    %c0_2 = arith.constant 0 : index
    %c0_3 = arith.constant 0 : index
    %c0_4 = arith.constant 0 : index
    %2 = vector.load %arg3[%c0_2, %c0_3, %c0_4] : memref<9x4x1xf32, #tpu.memory_space<vmem>>, vector<1x4x1xf32>
    %3 = vector.shape_cast %2 : vector<1x4x1xf32> to vector<4x1xf32>
    %c1 = arith.constant 1 : index
    %c0_5 = arith.constant 0 : index
    %c0_6 = arith.constant 0 : index
    %4 = vector.load %arg3[%c1, %c0_5, %c0_6] : memref<9x4x1xf32, #tpu.memory_space<vmem>>, vector<1x4x1xf32>
    %5 = vector.shape_cast %4 : vector<1x4x1xf32> to vector<4x1xf32>
    %c2 = arith.constant 2 : index
    %c0_7 = arith.constant 0 : index
    %c0_8 = arith.constant 0 : index
    %6 = vector.load %arg3[%c2, %c0_7, %c0_8] : memref<9x4x1xf32, #tpu.memory_space<vmem>>, vector<1x4x1xf32>
    %7 = vector.shape_cast %6 : vector<1x4x1xf32> to vector<4x1xf32>
    %c3 = arith.constant 3 : index
    %c0_9 = arith.constant 0 : index
    %c0_10 = arith.constant 0 : index
    %8 = vector.load %arg3[%c3, %c0_9, %c0_10] : memref<9x4x1xf32, #tpu.memory_space<vmem>>, vector<1x4x1xf32>
    %9 = vector.shape_cast %8 : vector<1x4x1xf32> to vector<4x1xf32>
    %c4 = arith.constant 4 : index
    %c0_11 = arith.constant 0 : index
    %c0_12 = arith.constant 0 : index
    %10 = vector.load %arg3[%c4, %c0_11, %c0_12] : memref<9x4x1xf32, #tpu.memory_space<vmem>>, vector<1x4x1xf32>
    %11 = vector.shape_cast %10 : vector<1x4x1xf32> to vector<4x1xf32>
    %c5 = arith.constant 5 : index
    %c0_13 = arith.constant 0 : index
    %c0_14 = arith.constant 0 : index
    %12 = vector.load %arg3[%c5, %c0_13, %c0_14] : memref<9x4x1xf32, #tpu.memory_space<vmem>>, vector<1x4x1xf32>
    %13 = vector.shape_cast %12 : vector<1x4x1xf32> to vector<4x1xf32>
    %c6 = arith.constant 6 : index
    %c0_15 = arith.constant 0 : index
    %c0_16 = arith.constant 0 : index
    %14 = vector.load %arg3[%c6, %c0_15, %c0_16] : memref<9x4x1xf32, #tpu.memory_space<vmem>>, vector<1x4x1xf32>
    %15 = vector.shape_cast %14 : vector<1x4x1xf32> to vector<4x1xf32>
    %c7 = arith.constant 7 : index
    %c0_17 = arith.constant 0 : index
    %c0_18 = arith.constant 0 : index
    %16 = vector.load %arg3[%c7, %c0_17, %c0_18] : memref<9x4x1xf32, #tpu.memory_space<vmem>>, vector<1x4x1xf32>
    %17 = vector.shape_cast %16 : vector<1x4x1xf32> to vector<4x1xf32>
    %c8 = arith.constant 8 : index
    %c0_19 = arith.constant 0 : index
    %c0_20 = arith.constant 0 : index
    %18 = vector.load %arg3[%c8, %c0_19, %c0_20] : memref<9x4x1xf32, #tpu.memory_space<vmem>>, vector<1x4x1xf32>
    %19 = vector.shape_cast %18 : vector<1x4x1xf32> to vector<4x1xf32>
    %c0_21 = arith.constant 0 : index
    %c0_22 = arith.constant 0 : index
    %c0_23 = arith.constant 0 : index
    %20 = vector.load %arg2[%c0_21, %c0_22, %c0_23] : memref<5x1x256xf32, #tpu.memory_space<vmem>>, vector<1x1x256xf32>
    %21 = vector.shape_cast %20 : vector<1x1x256xf32> to vector<1x256xf32>
    %c1_24 = arith.constant 1 : index
    %c0_25 = arith.constant 0 : index
    %c0_26 = arith.constant 0 : index
    %22 = vector.load %arg2[%c1_24, %c0_25, %c0_26] : memref<5x1x256xf32, #tpu.memory_space<vmem>>, vector<1x1x256xf32>
    %23 = vector.shape_cast %22 : vector<1x1x256xf32> to vector<1x256xf32>
    %c2_27 = arith.constant 2 : index
    %c0_28 = arith.constant 0 : index
    %c0_29 = arith.constant 0 : index
    %24 = vector.load %arg2[%c2_27, %c0_28, %c0_29] : memref<5x1x256xf32, #tpu.memory_space<vmem>>, vector<1x1x256xf32>
    %25 = vector.shape_cast %24 : vector<1x1x256xf32> to vector<1x256xf32>
    %c3_30 = arith.constant 3 : index
    %c0_31 = arith.constant 0 : index
    %c0_32 = arith.constant 0 : index
    %26 = vector.load %arg2[%c3_30, %c0_31, %c0_32] : memref<5x1x256xf32, #tpu.memory_space<vmem>>, vector<1x1x256xf32>
    %27 = vector.shape_cast %26 : vector<1x1x256xf32> to vector<1x256xf32>
    %c16_i32 = arith.constant 16 : i32
    %28 = tpu.dynamic_rotate %1 by %c16_i32 dim 1 : vector<4x256xf32>, i32 -> vector<4x256xf32>
    %29 = vector.broadcast %21 : vector<1x256xf32> to vector<4x256xf32>
    %30 = arith.mulf %28, %29 : vector<4x256xf32>
    %c240_i32 = arith.constant 240 : i32
    %31 = tpu.dynamic_rotate %1 by %c240_i32 dim 1 : vector<4x256xf32>, i32 -> vector<4x256xf32>
    %32 = vector.broadcast %23 : vector<1x256xf32> to vector<4x256xf32>
    %33 = arith.mulf %31, %32 : vector<4x256xf32>
    %34 = vector.broadcast %3 : vector<4x1xf32> to vector<4x256xf32>
    %35 = arith.mulf %30, %34 : vector<4x256xf32>
    %36 = vector.broadcast %9 : vector<4x1xf32> to vector<4x256xf32>
    %37 = arith.mulf %1, %36 : vector<4x256xf32>
    %38 = arith.addf %35, %37 : vector<4x256xf32>
    %39 = vector.broadcast %15 : vector<4x1xf32> to vector<4x256xf32>
    %40 = arith.mulf %33, %39 : vector<4x256xf32>
    %41 = arith.addf %38, %40 : vector<4x256xf32>
    %42 = vector.broadcast %5 : vector<4x1xf32> to vector<4x256xf32>
    %43 = arith.mulf %30, %42 : vector<4x256xf32>
    %44 = vector.broadcast %11 : vector<4x1xf32> to vector<4x256xf32>
    %45 = arith.mulf %1, %44 : vector<4x256xf32>
    %46 = arith.addf %43, %45 : vector<4x256xf32>
    %47 = vector.broadcast %17 : vector<4x1xf32> to vector<4x256xf32>
    %48 = arith.mulf %33, %47 : vector<4x256xf32>
    %49 = arith.addf %46, %48 : vector<4x256xf32>
    %50 = vector.broadcast %7 : vector<4x1xf32> to vector<4x256xf32>
    %51 = arith.mulf %30, %50 : vector<4x256xf32>
    %52 = vector.broadcast %13 : vector<4x1xf32> to vector<4x256xf32>
    %53 = arith.mulf %1, %52 : vector<4x256xf32>
    %54 = arith.addf %51, %53 : vector<4x256xf32>
    %55 = vector.broadcast %19 : vector<4x1xf32> to vector<4x256xf32>
    %56 = arith.mulf %33, %55 : vector<4x256xf32>
    %57 = arith.addf %54, %56 : vector<4x256xf32>
    %c1_i32 = arith.constant 1 : i32
    %58 = tpu.dynamic_rotate %41 by %c1_i32 dim 1 : vector<4x256xf32>, i32 -> vector<4x256xf32>
    %59 = vector.broadcast %25 : vector<1x256xf32> to vector<4x256xf32>
    %60 = arith.mulf %58, %59 : vector<4x256xf32>
    %61 = arith.addf %49, %60 : vector<4x256xf32>
    %c255_i32 = arith.constant 255 : i32
    %62 = tpu.dynamic_rotate %57 by %c255_i32 dim 1 : vector<4x256xf32>, i32 -> vector<4x256xf32>
    %63 = vector.broadcast %27 : vector<1x256xf32> to vector<4x256xf32>
    %64 = arith.mulf %62, %63 : vector<4x256xf32>
    %65 = arith.addf %61, %64 : vector<4x256xf32>
    %c0_33 = arith.constant 0 : index
    %c0_34 = arith.constant 0 : index
    %66 = vector.load %arg4[%c0_33, %c0_34] : memref<4x1xf32, #tpu.memory_space<vmem>>, vector<4x1xf32>
    %c0_35 = arith.constant 0 : index
    %c0_36 = arith.constant 0 : index
    %67 = vector.load %arg5[%c0_35, %c0_36] : memref<4x1xf32, #tpu.memory_space<vmem>>, vector<4x1xf32>
    %c0_37 = arith.constant 0 : index
    %c0_38 = arith.constant 0 : index
    %68 = vector.load %arg6[%c0_37, %c0_38] : memref<4x1xf32, #tpu.memory_space<vmem>>, vector<4x1xf32>
    %cst = arith.constant dense<0.000000e+00> : vector<4xf32>
    %69 = vector.multi_reduction <add>, %65, %cst [1] : vector<4x256xf32> to vector<4xf32>
    %70 = vector.shape_cast %69 : vector<4xf32> to vector<4x1xf32>
    %71 = arith.mulf %65, %65 : vector<4x256xf32>
    %cst_39 = arith.constant dense<0.000000e+00> : vector<4xf32>
    %72 = vector.multi_reduction <add>, %71, %cst_39 [1] : vector<4x256xf32> to vector<4xf32>
    %73 = vector.shape_cast %72 : vector<4xf32> to vector<4x1xf32>
    %74 = arith.mulf %70, %66 : vector<4x1xf32>
    %cst_40 = arith.constant dense<0.000000e+00> : vector<1xf32>
    %75 = vector.multi_reduction <add>, %74, %cst_40 [0] : vector<4x1xf32> to vector<1xf32>
    %76 = vector.shape_cast %75 : vector<1xf32> to vector<1x1xf32>
    %cst_41 = arith.constant 9.765625E-4 : f32
    %77 = vector.broadcast %cst_41 : f32 to vector<1x1xf32>
    %78 = arith.mulf %76, %77 : vector<1x1xf32>
    %79 = arith.mulf %73, %66 : vector<4x1xf32>
    %cst_42 = arith.constant dense<0.000000e+00> : vector<1xf32>
    %80 = vector.multi_reduction <add>, %79, %cst_42 [0] : vector<4x1xf32> to vector<1xf32>
    %81 = vector.shape_cast %80 : vector<1xf32> to vector<1x1xf32>
    %cst_43 = arith.constant 9.765625E-4 : f32
    %82 = vector.broadcast %cst_43 : f32 to vector<1x1xf32>
    %83 = arith.mulf %81, %82 : vector<1x1xf32>
    %84 = arith.mulf %78, %78 : vector<1x1xf32>
    %85 = arith.subf %83, %84 : vector<1x1xf32>
    %cst_44 = arith.constant 9.99999974E-6 : f32
    %86 = vector.broadcast %cst_44 : f32 to vector<1x1xf32>
    %87 = arith.addf %85, %86 : vector<1x1xf32>
    %88 = math.rsqrt %87 : vector<1x1xf32>
    %89 = vector.broadcast %78 : vector<1x1xf32> to vector<4x1xf32>
    %90 = arith.mulf %66, %89 : vector<4x1xf32>
    %cst_45 = arith.constant dense<0.000000e+00> : vector<4xf32>
    %91 = vector.multi_reduction <add>, %90, %cst_45 [1] : vector<4x1xf32> to vector<4xf32>
    %92 = vector.shape_cast %91 : vector<4xf32> to vector<4x1xf32>
    %93 = vector.broadcast %88 : vector<1x1xf32> to vector<4x1xf32>
    %94 = arith.mulf %66, %93 : vector<4x1xf32>
    %cst_46 = arith.constant dense<0.000000e+00> : vector<4xf32>
    %95 = vector.multi_reduction <add>, %94, %cst_46 [1] : vector<4x1xf32> to vector<4xf32>
    %96 = vector.shape_cast %95 : vector<4xf32> to vector<4x1xf32>
    %97 = arith.mulf %96, %67 : vector<4x1xf32>
    %98 = arith.mulf %92, %97 : vector<4x1xf32>
    %99 = arith.subf %68, %98 : vector<4x1xf32>
    %100 = vector.broadcast %97 : vector<4x1xf32> to vector<4x256xf32>
    %101 = arith.mulf %65, %100 : vector<4x256xf32>
    %102 = vector.broadcast %99 : vector<4x1xf32> to vector<4x256xf32>
    %103 = arith.addf %101, %102 : vector<4x256xf32>
    %cst_47 = arith.constant 5.000000e-01 : f32
    %104 = vector.broadcast %cst_47 : f32 to vector<4x256xf32>
    %105 = arith.mulf %104, %103 : vector<4x256xf32>
    %cst_48 = arith.constant 0.707106769 : f32
    %106 = vector.broadcast %cst_48 : f32 to vector<4x256xf32>
    %107 = arith.mulf %103, %106 : vector<4x256xf32>
    %cst_49 = arith.constant 0.000000e+00 : f32
    %108 = vector.broadcast %cst_49 : f32 to vector<4x256xf32>
    %109 = arith.cmpf oge, %107, %108 : vector<4x256xf32>
    %cst_50 = arith.constant 1.000000e+00 : f32
    %cst_51 = arith.constant -1.000000e+00 : f32
    %110 = vector.broadcast %cst_50 : f32 to vector<4x256xf32>
    %111 = vector.broadcast %cst_51 : f32 to vector<4x256xf32>
    %112 = arith.select %109, %110, %111 : vector<4x256xi1>, vector<4x256xf32>
    %113 = math.absf %107 : vector<4x256xf32>
    %cst_52 = arith.constant 0.327591091 : f32
    %114 = vector.broadcast %cst_52 : f32 to vector<4x256xf32>
    %115 = arith.mulf %114, %113 : vector<4x256xf32>
    %cst_53 = arith.constant 1.000000e+00 : f32
    %116 = vector.broadcast %cst_53 : f32 to vector<4x256xf32>
    %117 = arith.addf %116, %115 : vector<4x256xf32>
    %118 = tpu.reciprocal %117 : vector<4x256xf32> -> vector<4x256xf32>
    %cst_54 = arith.constant 1.06140542 : f32
    %119 = vector.broadcast %cst_54 : f32 to vector<4x256xf32>
    %120 = arith.mulf %118, %119 : vector<4x256xf32>
    %cst_55 = arith.constant -1.45315206 : f32
    %121 = vector.broadcast %cst_55 : f32 to vector<4x256xf32>
    %122 = arith.addf %121, %120 : vector<4x256xf32>
    %123 = arith.mulf %118, %122 : vector<4x256xf32>
    %cst_56 = arith.constant 1.42141378 : f32
    %124 = vector.broadcast %cst_56 : f32 to vector<4x256xf32>
    %125 = arith.addf %124, %123 : vector<4x256xf32>
    %126 = arith.mulf %118, %125 : vector<4x256xf32>
    %cst_57 = arith.constant -0.284496725 : f32
    %127 = vector.broadcast %cst_57 : f32 to vector<4x256xf32>
    %128 = arith.addf %127, %126 : vector<4x256xf32>
    %129 = arith.mulf %118, %128 : vector<4x256xf32>
    %cst_58 = arith.constant 0.254829586 : f32
    %130 = vector.broadcast %cst_58 : f32 to vector<4x256xf32>
    %131 = arith.addf %130, %129 : vector<4x256xf32>
    %132 = arith.mulf %118, %131 : vector<4x256xf32>
    %cst_59 = arith.constant 0.000000e+00 : f32
    %133 = vector.broadcast %cst_59 : f32 to vector<4x256xf32>
    %134 = arith.subf %133, %113 : vector<4x256xf32>
    %135 = arith.mulf %134, %113 : vector<4x256xf32>
    %136 = math.exp %135 : vector<4x256xf32>
    %137 = arith.mulf %132, %136 : vector<4x256xf32>
    %cst_60 = arith.constant 1.000000e+00 : f32
    %138 = vector.broadcast %cst_60 : f32 to vector<4x256xf32>
    %139 = arith.subf %138, %137 : vector<4x256xf32>
    %140 = arith.mulf %112, %139 : vector<4x256xf32>
    %cst_61 = arith.constant 1.000000e+00 : f32
    %141 = vector.broadcast %cst_61 : f32 to vector<4x256xf32>
    %142 = arith.addf %141, %140 : vector<4x256xf32>
    %143 = arith.mulf %105, %142 : vector<4x256xf32>
    %c0_62 = arith.constant 0 : index
    %c0_63 = arith.constant 0 : index
    %144 = vector.load %arg7[%c0_62, %c0_63] : memref<8x4xf32, #tpu.memory_space<vmem>>, vector<8x4xf32>
    %cst_64 = arith.constant dense<0.000000e+00> : vector<8x256xf32>
    %145 = tpu.matmul %144, %143, %cst_64 {dimension_numbers = #tpu.dot_dimension_numbers<[1], [0], [0], [1], [0, 0, 1, 1], [], []>} : vector<8x4xf32>, vector<4x256xf32>, vector<8x256xf32> -> vector<8x256xf32>
    %c0_65 = arith.constant 0 : index
    %c0_66 = arith.constant 0 : index
    %146 = vector.load %arg8[%c0_65, %c0_66] : memref<8x2xf32, #tpu.memory_space<vmem>>, vector<8x2xf32>
    %c0_67 = arith.constant 0 : index
    %c0_68 = arith.constant 0 : index
    %147 = vector.load %arg9[%c0_67, %c0_68] : memref<8x1xf32, #tpu.memory_space<vmem>>, vector<8x1xf32>
    %c0_69 = arith.constant 0 : index
    %c0_70 = arith.constant 0 : index
    %148 = vector.load %arg10[%c0_69, %c0_70] : memref<8x1xf32, #tpu.memory_space<vmem>>, vector<8x1xf32>
    %cst_71 = arith.constant dense<0.000000e+00> : vector<8xf32>
    %149 = vector.multi_reduction <add>, %145, %cst_71 [1] : vector<8x256xf32> to vector<8xf32>
    %150 = vector.shape_cast %149 : vector<8xf32> to vector<8x1xf32>
    %151 = arith.mulf %145, %145 : vector<8x256xf32>
    %cst_72 = arith.constant dense<0.000000e+00> : vector<8xf32>
    %152 = vector.multi_reduction <add>, %151, %cst_72 [1] : vector<8x256xf32> to vector<8xf32>
    %153 = vector.shape_cast %152 : vector<8xf32> to vector<8x1xf32>
    %154 = vector.broadcast %150 : vector<8x1xf32> to vector<8x2xf32>
    %155 = arith.mulf %154, %146 : vector<8x2xf32>
    %cst_73 = arith.constant dense<0.000000e+00> : vector<2xf32>
    %156 = vector.multi_reduction <add>, %155, %cst_73 [0] : vector<8x2xf32> to vector<2xf32>
    %157 = vector.shape_cast %156 : vector<2xf32> to vector<1x2xf32>
    %cst_74 = arith.constant 9.765625E-4 : f32
    %158 = vector.broadcast %cst_74 : f32 to vector<1x2xf32>
    %159 = arith.mulf %157, %158 : vector<1x2xf32>
    %160 = vector.broadcast %153 : vector<8x1xf32> to vector<8x2xf32>
    %161 = arith.mulf %160, %146 : vector<8x2xf32>
    %cst_75 = arith.constant dense<0.000000e+00> : vector<2xf32>
    %162 = vector.multi_reduction <add>, %161, %cst_75 [0] : vector<8x2xf32> to vector<2xf32>
    %163 = vector.shape_cast %162 : vector<2xf32> to vector<1x2xf32>
    %cst_76 = arith.constant 9.765625E-4 : f32
    %164 = vector.broadcast %cst_76 : f32 to vector<1x2xf32>
    %165 = arith.mulf %163, %164 : vector<1x2xf32>
    %166 = arith.mulf %159, %159 : vector<1x2xf32>
    %167 = arith.subf %165, %166 : vector<1x2xf32>
    %cst_77 = arith.constant 9.99999974E-6 : f32
    %168 = vector.broadcast %cst_77 : f32 to vector<1x2xf32>
    %169 = arith.addf %167, %168 : vector<1x2xf32>
    %170 = math.rsqrt %169 : vector<1x2xf32>
    %171 = vector.broadcast %159 : vector<1x2xf32> to vector<8x2xf32>
    %172 = arith.mulf %146, %171 : vector<8x2xf32>
    %cst_78 = arith.constant dense<0.000000e+00> : vector<8xf32>
    %173 = vector.multi_reduction <add>, %172, %cst_78 [1] : vector<8x2xf32> to vector<8xf32>
    %174 = vector.shape_cast %173 : vector<8xf32> to vector<8x1xf32>
    %175 = vector.broadcast %170 : vector<1x2xf32> to vector<8x2xf32>
    %176 = arith.mulf %146, %175 : vector<8x2xf32>
    %cst_79 = arith.constant dense<0.000000e+00> : vector<8xf32>
    %177 = vector.multi_reduction <add>, %176, %cst_79 [1] : vector<8x2xf32> to vector<8xf32>
    %178 = vector.shape_cast %177 : vector<8xf32> to vector<8x1xf32>
    %179 = arith.mulf %178, %147 : vector<8x1xf32>
    %180 = arith.mulf %174, %179 : vector<8x1xf32>
    %181 = arith.subf %148, %180 : vector<8x1xf32>
    %182 = vector.broadcast %179 : vector<8x1xf32> to vector<8x256xf32>
    %183 = arith.mulf %145, %182 : vector<8x256xf32>
    %184 = vector.broadcast %181 : vector<8x1xf32> to vector<8x256xf32>
    %185 = arith.addf %183, %184 : vector<8x256xf32>
    %c0_80 = arith.constant 0 : index
    %c0_81 = arith.constant 0 : index
    %c0_82 = arith.constant 0 : index
    %186 = vector.load %arg11[%c0_80, %c0_81, %c0_82] : memref<1x8x256xf32, #tpu.memory_space<vmem>>, vector<1x8x256xf32>
    %187 = vector.shape_cast %186 : vector<1x8x256xf32> to vector<8x256xf32>
    %188 = vector.shape_cast %185 : vector<8x256xf32> to vector<1x8x256xf32>
    tpu.vector_store %arg11[%c0_80, %c0_81, %c0_82], %188 {strides = array<i32>} : memref<1x8x256xf32, #tpu.memory_space<vmem>>, vector<1x8x256xf32>,
    return
  }
  func.func @transform_0(%arg0: i32) -> (i32, i32, i32) {
    %c0_i32 = arith.constant 0 : i32
    %c0_i32_0 = arith.constant 0 : i32
    %c0_i32_1 = arith.constant 0 : i32
    return %arg0, %c0_i32, %c0_i32_0 : i32, i32, i32
  }
  func.func @transform_1(%arg0: i32) -> (i32, i32, i32) {
    %c0_i32 = arith.constant 0 : i32
    %c0_i32_0 = arith.constant 0 : i32
    %c0_i32_1 = arith.constant 0 : i32
    %c0_i32_2 = arith.constant 0 : i32
    return %c0_i32, %c0_i32_0, %c0_i32_1 : i32, i32, i32
  }
  func.func @transform_2(%arg0: i32) -> (i32, i32, i32) {
    %c0_i32 = arith.constant 0 : i32
    %c0_i32_0 = arith.constant 0 : i32
    %c0_i32_1 = arith.constant 0 : i32
    %c0_i32_2 = arith.constant 0 : i32
    return %c0_i32, %c0_i32_0, %c0_i32_1 : i32, i32, i32
  }
  func.func @transform_3(%arg0: i32) -> (i32, i32) {
    %c0_i32 = arith.constant 0 : i32
    %c0_i32_0 = arith.constant 0 : i32
    %c0_i32_1 = arith.constant 0 : i32
    return %c0_i32, %c0_i32_0 : i32, i32
  }
  func.func @transform_4(%arg0: i32) -> (i32, i32) {
    %c0_i32 = arith.constant 0 : i32
    %c0_i32_0 = arith.constant 0 : i32
    %c0_i32_1 = arith.constant 0 : i32
    return %c0_i32, %c0_i32_0 : i32, i32
  }
  func.func @transform_5(%arg0: i32) -> (i32, i32) {
    %c0_i32 = arith.constant 0 : i32
    %c0_i32_0 = arith.constant 0 : i32
    %c0_i32_1 = arith.constant 0 : i32
    return %c0_i32, %c0_i32_0 : i32, i32
  }
  func.func @transform_6(%arg0: i32) -> (i32, i32) {
    %c0_i32 = arith.constant 0 : i32
    %c0_i32_0 = arith.constant 0 : i32
    %c0_i32_1 = arith.constant 0 : i32
    return %c0_i32, %c0_i32_0 : i32, i32
  }
  func.func @transform_7(%arg0: i32) -> (i32, i32) {
    %c0_i32 = arith.constant 0 : i32
    %c0_i32_0 = arith.constant 0 : i32
    %c0_i32_1 = arith.constant 0 : i32
    return %c0_i32, %c0_i32_0 : i32, i32
  }
  func.func @transform_8(%arg0: i32) -> (i32, i32) {
    %c0_i32 = arith.constant 0 : i32
    %c0_i32_0 = arith.constant 0 : i32
    %c0_i32_1 = arith.constant 0 : i32
    return %c0_i32, %c0_i32_0 : i32, i32
  }
  func.func @transform_9(%arg0: i32) -> (i32, i32) {
    %c0_i32 = arith.constant 0 : i32
    %c0_i32_0 = arith.constant 0 : i32
    %c0_i32_1 = arith.constant 0 : i32
    return %c0_i32, %c0_i32_0 : i32, i32
  }
  func.func @transform_10(%arg0: i32) -> (i32, i32, i32) {
    %c0_i32 = arith.constant 0 : i32
    %c0_i32_0 = arith.constant 0 : i32
    %c0_i32_1 = arith.constant 0 : i32
    return %arg0, %c0_i32, %c0_i32_0 : i32, i32, i32
  }
}

</mosaic_0001>

<bundles_post_ra>
// kernel: tpu_custom_call.1
= control target key start
LH: loop header
LB: loop body
LE: loop exit
PB: predicated region body
PF: predicated region fallthrough
CT: control target
= control target key end

     0   :  { %15 = vsyncpa [#allocation3], 0  ;;  %s1309_s0 = inlined_call_operand.vmem [shape: f32[2,4,256], index: 0, kind: input, shape index: {}]   ;;  %s1310_s1 = inlined_call_operand.vmem [shape: f32[5,1,256], index: 1, kind: input, shape index: {}]   ;;  %s1311_s2 = inlined_call_operand.vmem [shape: f32[9,4,1], index: 2, kind: input, shape index: {}]   ;;  %s1312_s3 = inlined_call_operand.vmem [shape: f32[4,1], index: 3, kind: input, shape index: {}]   ;;  %s1313_s4 = inlined_call_operand.vmem [shape: f32[4,1], index: 4, kind: input, shape index: {}]   ;;  %s1314_s5 = inlined_call_operand.vmem [shape: f32[4,1], index: 5, kind: input, shape index: {}]   ;;  %s1315_s6 = inlined_call_operand.vmem [shape: f32[8,4], index: 6, kind: input, shape index: {}]   ;;  %s1316_s7 = inlined_call_operand.vmem [shape: f32[8,2], index: 7, kind: input, shape index: {}]   ;;  %s1317_s8 = inlined_call_operand.vmem [shape: f32[8,1], index: 8, kind: input, shape index: {}]   ;;  %s1318_s9 = inlined_call_operand.vmem [shape: f32[8,1], index: 9, kind: input, shape index: {}]   ;;  %s1319_s10 = inlined_call_operand.hbm [shape: f32[2,8,256], index: 10, kind: output, shape index: {}]  }
   0x1   :  { %17 = vsyncpa [#allocation3 + $0x1], 0  ;;  %s1119_s13 = smov 0   ;;  %s1121_s14 = smov 0  }
   0x2   :  { %s1123_s15 = smov 0   ;;  %s1125_s16 = smov 0  }
   0x3 LB: > { %s1140_s17 = sadd.s32 4294967295, %s1053_s16   ;;  %s903_s18 = sadd.s32 4294967294, %s1053_s16   ;;  %s1053_s16 = sphi %s1125_s16, %s1325_s16   ;;  %s1049_s15 = sphi %s1123_s15, %s1324_s15   ;;  %s1045_s14 = sphi %s1121_s14, %s1323_s14   ;;  %s1041_s13 = sphi %s1119_s13, %s1322_s13  }
   0x4   : > { %s1144_s19 = sadd.s32 1, %s1053_s16   ;;  %s245_s20 = sadd.s32 1, %s1049_s15 }
   0x5   : > { %s242_s21 = ssub.s32 %s1053_s16, %s1144_s19  ;;  %p255_p0 = scmp.ne.s32.totalorder %s1049_s15, %s1045_s14 }
   0x6   : > { %p243_p1 = scmp.eq.s32.totalorder %s242_s21, 0  ;;  %p256_p2 = scmp.eq.s32.totalorder %s1140_s17, 1 }
   0x7   : > { %p261_p3 = scmp.ne.s32.totalorder %s1045_s14, %s1041_s13  ;;  %p262_p4 = scmp.eq.s32.totalorder %s903_s18, 1 }
   0x8   : > { %s1155_s22 = scalar_select %p243_p1, %s1049_s15, %s245_s20  }
   0x9   : > { %p1157_p5 = por %p256_p2, %p255_p0  ;;  %p1161_p6 = por %p262_p4, %p261_p3 }
   0xa   : > { %p906_p7 = scmp.ge.s32.totalorder %s1053_s16, 1  ;;  %p315_p8 = scmp.lt.s32.totalorder %s1053_s16, 3 }
   0xc   : > { %p316_p9 = pnand %p906_p7, %p315_p8 }
   0xd   : > { %p353_p10 = scmp.lt.s32.totalorder (!%p316_p9), %s1140_s17, 1  ;;  %s1056_s25 = smov (!%p316_p9), 16  }
   0xe   : > { %319 = sbr.rel (%p316_p9) target bundleno = 1315 (0x523), region = 60  ;;  %s1057_s30 = smov (!%p316_p9), 112  }
   0xf   : > { %s1060_s18 = smov (!%p316_p9), 127  }
  0x13   : > { %v912_v0 = vld [vmem:[%s1311_s2 + $0xc] sm:$0xf]  ;;  %v359_v1 = vld [vmem:[%s1311_s2] sm:$0xf]  ;;  %v1055_v2 = vmov 0   ;;  %s354_s29 = scalar_select %p353_p10, %s1140_s17, 1  ;;  %v390_v12 = vlaneseq }
  0x14   : > { %979 = vset.pattern.permute.xlu1 %v1055_v2  ;;  %978 = vset.pattern.permute.xlu0 %v1055_v2  ;;  %v914_v3 = vld [vmem:[%s1311_s2 + $0x14] sm:$0xf]  ;;  %v915_v6 = vld [vmem:[%s1311_s2 + $0x18] sm:$0xf]  ;;  %v911_v7 = vld [vmem:[%s1311_s2 + $0x8] sm:$0xf] }
  0x15   : > { %437 = vperm.xlu0 %978, %v912_v0   ;;  %430 = vperm.xlu1 %979, %v359_v1   ;;  %s929_s12 = sshll.u32 %s354_s29, 3  ;;  %v917_v8 = vld [vmem:[%s1311_s2 + $0x20] sm:$0xf]  ;;  %v913_v9 = vld [vmem:[%s1311_s2 + $0x10] sm:$0xf]  ;;  %v397_v17 = vshrl.u32 %v390_v12, 7 }
  0x16   : > { %s357_s21 = scalar_lea.vmem %s1309_s0, %s929_s12  ;;  %v910_v10 = vld [vmem:[%s1311_s2 + $0x4] sm:$0xf]  ;;  %v916_v11 = vld [vmem:[%s1311_s2 + $0x1c] sm:$0xf]  ;;  %v1058_v13 = vmov 839922192  }
  0x17   : > { %v1181_v4 = vld [vmem:[%s357_s21] sm:$0xff]  ;;  %v440_v14 = vunpack.c.l.s4 %v1058_v13  ;;  %v1205_v19 = vand.u32 127, %v390_v12  ;;  %v1207_v22 = vsub.s32 0, %v397_v17  ;;  %v1209_v23 = vsub.s32 1, %v397_v17  ;;  %s1059_s12 = smov 1  }
  0x18   : > { %v384_v5 = vcombine.high %v1181_v4, %v1181_v4  ;;  %v376_v24 = vld [vmem:[%s1310_s1] sm:$0x3]  ;;  %v918_v33 = vld [vmem:[%s1310_s1 + $0x2] sm:$0x3]  ;;  %vm577_vm4 = vcmask 1043456   ;;  %vm591_vm5 = vcmask 3072  }
  0x19   : > { %505 = vperm.xlu0 %978, %v914_v3   ;;  %386 = vrot.lane.b32.xlu1 %v1181_v4, %s1056_s25  ;;  %v441_v18 = vunpack.c.0.s8 %v440_v14  ;;  %vm392_vm0 = vcmp.lt.s32.totalorder %v1205_v19, 16  ;;  %v399_v27 = vrot.slane %v376_v24, %v1207_v22  ;;  %v403_v28 = vrot.slane %v376_v24, %v1209_v23 }
  0x1a   : > { %vm412_vm1 = vcmp.lt.s32.totalorder %v1205_v19, 112  ;;  %v419_v39 = vrot.slane %v918_v33, %v1207_v22  ;;  %v423_v40 = vrot.slane %v918_v33, %v1209_v23  ;;  %vm534_vm2 = vcmp.lt.s32.totalorder %v1205_v19, 1 }
  0x1b   : > { %v444_v25 = vsub.s32 %v441_v18, %v397_v17  ;;  %vm556_vm3 = vcmp.lt.s32.totalorder %v1205_v19, 127  ;;  %vm687_vm8 = vcmask 31744   ;;  %vm780_vm9 = vcmask 15360  }
  0x1d   : > { %388 = vrot.lane.b32.xlu0 %v384_v5, %s1056_s25  ;;  %455 = vperm.xlu1 %979, %v915_v6  }
  0x21   : > { %498 = vperm.xlu0 %978, %v911_v7   ;;  %408 = vrot.lane.b32.xlu1 %v1181_v4, %s1057_s30 }
  0x25   : > { %410 = vrot.lane.b32.xlu0 %v384_v5, %s1057_s30  ;;  %523 = vperm.xlu1 %979, %v917_v8   ;;  %s350_s30 = sand.u32 1, %s1045_s14  }
  0x26   : > { %s907_s11 = sshll.u32 %s350_s30, 4  ;;  %s830_s27 = scalar_lea.sflag [#allocation3], %s350_s30 }
  0x29   : > { %471 = vperm.xlu0 %978, %v913_v9   ;;  %464 = vperm.xlu1 %979, %v910_v10  }
  0x2d   : > { %489 = vperm.xlu0 %978, %v916_v11  }
  0x90   : > { %v438_v15 = vpop.permute.xlu0 %437  ;;  %v431_v16 = vpop.permute.xlu1 %430 }
  0x91   : > { %v445_v32 = vrot.slane %v438_v15, %v444_v25 }
  0x93   : > { %v447_v41 = vmul.f32 %v445_v32, %v1181_v4 }
  0x94   : > { %v506_v20 = vpop.permute.xlu0 %505  ;;  %v387_v21 = vpop.permute.xlu1 %386 }
  0x95   : > { %v513_v38 = vrot.slane %v506_v20, %v444_v25  ;;  %v449_v51 = vcombine.high %v447_v41, %v447_v41 }
  0x97   : > { %v515_v48 = vmul.f32 %v513_v38, %v1181_v4 }
  0x98   : > { %v389_v26 = vpop.permute.xlu0 %388  ;;  %v456_v29 = vpop.permute.xlu1 %455 }
  0x99   : > { %v393_v30 = vsel %vm392_vm0, %v387_v21, %v389_v26  ;;  %v394_v31 = vsel %vm392_vm0, %v389_v26, %v387_v21  ;;  %v517_v61 = vcombine.high %v515_v48, %v515_v48  ;;  %v920_v21 = vld [vmem:[%s1310_s1 + $0x6] sm:$0x3] }
  0x9a   : > { %v406_v35 = vmul.f32 %v399_v27, %v394_v31  ;;  %v407_v36 = vmul.f32 %v403_v28, %v393_v30  ;;  %v563_v30 = vrot.slane %v920_v21, %v1207_v22  ;;  %v567_v31 = vrot.slane %v920_v21, %v1209_v23 }
  0x9c   : > { %v499_v34 = vpop.permute.xlu0 %498  ;;  %v409_v37 = vpop.permute.xlu1 %408  ;;  %v433_v43 = vmul.f32 %v431_v16, %v406_v35  ;;  %v434_v44 = vmul.f32 %v431_v16, %v407_v36 }
  0x9d   : > { %v501_v52 = vmul.f32 %v499_v34, %v406_v35  ;;  %v502_v53 = vmul.f32 %v499_v34, %v407_v36 }
  0x9e   : > { %v452_v59 = vadd.f32 %v449_v51, %v434_v44  ;;  %v451_v60 = vadd.f32 %v447_v41, %v433_v43 }
  0x9f   : > { %v519_v5 = vadd.f32 %v515_v48, %v501_v52  ;;  %v520_v6 = vadd.f32 %v517_v61, %v502_v53 }
  0xa0   : > { %v411_v42 = vpop.permute.xlu0 %410  ;;  %v524_v47 = vpop.permute.xlu1 %523 }
  0xa1   : > { %v413_v45 = vsel %vm412_vm1, %v409_v37, %v411_v42  ;;  %v414_v46 = vsel %vm412_vm1, %v411_v42, %v409_v37 }
  0xa2   : > { %v426_v49 = vmul.f32 %v419_v39, %v413_v45  ;;  %v427_v50 = vmul.f32 %v423_v40, %v414_v46 }
  0xa4   : > { %v472_v54 = vpop.permute.xlu0 %471  ;;  %v459_v55 = vmul.f32 %v456_v29, %v427_v50  ;;  %v458_v56 = vmul.f32 %v456_v29, %v426_v49  ;;  %v465_v58 = vpop.permute.xlu1 %464  ;;  %v526_v62 = vmul.f32 %v524_v47, %v426_v49  ;;  %v527_v0 = vmul.f32 %v524_v47, %v427_v50  ;;  %v574_v47 = vld [vmem:[%s1312_s3] sm:$0xf] }
  0xa5   : > { %v479_v57 = vrot.slane %v472_v54, %v444_v25  ;;  %v467_v63 = vmul.f32 %v465_v58, %v406_v35  ;;  %v468_v7 = vmul.f32 %v465_v58, %v407_v36 }
  0xa6   : > { %v461_v2 = vadd.f32 %v459_v55, %v452_v59  ;;  %v460_v3 = vadd.f32 %v458_v56, %v451_v60  ;;  %v528_v12 = vadd.f32 %v526_v62, %v519_v5  ;;  %v529_v13 = vadd.f32 %v527_v0, %v520_v6 }
  0xa7   : > { %v481_v1 = vmul.f32 %v479_v57, %v1181_v4  ;;  %v919_v4 = vld [vmem:[%s1310_s1 + $0x4] sm:$0x3] }
  0xa8   : > { %v490_v8 = vpop.permute.xlu0 %489  ;;  %532 = vrot.lane.b32.xlu0 %v461_v2, %s1059_s12  ;;  %530 = vrot.lane.b32.xlu1 %v460_v3, %s1059_s12  ;;  %v541_v18 = vrot.slane %v919_v4, %v1207_v22  ;;  %v545_v20 = vrot.slane %v919_v4, %v1209_v23  ;;  %s930_s12 = sshll.u32 %s1140_s17, 8  ;;  %s1063_s17 = smov [#allocation2]  }
  0xa9   : > { %v483_v9 = vcombine.high %v481_v1, %v481_v1  ;;  %v485_v10 = vadd.f32 %v481_v1, %v467_v63  ;;  %v492_v11 = vmul.f32 %v490_v8, %v426_v49  ;;  %v493_v15 = vmul.f32 %v490_v8, %v427_v50  ;;  %s1274_s26 = scalar_lea.hbm %s1319_s10, %s930_s12  ;;  %s997_s29 = sshll.u32 %s1063_s17, 4  ;;  %s998_s29 = int_to_ptr.vmem [resolvable:$false] %s997_s29 }
  0xab   : > { %v486_v14 = vadd.f32 %v483_v9, %v468_v7  ;;  %v494_v16 = vadd.f32 %v492_v11, %v485_v10  ;;  %v575_v9 = vld [vmem:[%s1313_s4] sm:$0xf] }
  0xac   : > { %554 = vrot.lane.b32.xlu0 %v529_v13, %s1060_s18  ;;  %552 = vrot.lane.b32.xlu1 %v528_v12, %s1060_s18  ;;  %v576_v13 = vld [vmem:[%s1314_s5] sm:$0xf]  ;;  %s352_s18 = scalar_lea.vmem [#allocation2], %s907_s11  ;;  %s999_s11 = scalar_lea.vmem %s998_s29, 512 }
  0xad   : > { %v495_v17 = vadd.f32 %v493_v15, %v486_v14  ;;  %s844_s20 = sshll.u32 %s352_s18, 4  ;;  %s845_s20 = int_to_ptr.vmem [resolvable:$true] %s844_s20 }
  0xae   : > { %s993_s28 = scalar_lea.vmem %s845_s20, 256  ;;  %p1000_p0 = scmp.lt.s32.totalorder %s845_s20, %s998_s29 }
  0xaf   : > { %p994_p11 = scmp.ne.s32.totalorder %s845_s20, %s993_s28  ;;  %p1001_p1 = scmp.lt.s32.totalorder %s999_s11, %s993_s28 }
  0xb1   : > { %p995_p12 = pnand %p994_p11, %p1157_p5  ;;  %p1002_p2 = por %p1001_p1, %p1000_p0 }
  0xb3   : > { %p996_p13 = pneg %p995_p12 }
  0xb5   : > { %p1003_p3 = pnand %p1002_p2, %p996_p13 }
 0x11a   : > { %v531_v24 = vpop.permute.xlu1 %530  ;;  %v533_v25 = vpop.permute.xlu0 %532 }
 0x11b   : > { %v535_v26 = vsel %vm534_vm2, %v531_v24, %v533_v25  ;;  %v536_v27 = vsel %vm534_vm2, %v533_v25, %v531_v24 }
 0x11c   : > { %v548_v28 = vmul.f32 %v541_v18, %v536_v27  ;;  %v549_v29 = vmul.f32 %v545_v20, %v535_v26 }
 0x11e   : > { %v553_v32 = vpop.permute.xlu1 %552  ;;  %v555_v33 = vpop.permute.xlu0 %554  ;;  %v550_v36 = vadd.f32 %v548_v28, %v494_v16  ;;  %v551_v37 = vadd.f32 %v549_v29, %v495_v17  ;;  %v1061_v16 = vmov 0.0  }
 0x11f   : > { %v557_v34 = vsel %vm556_vm3, %v553_v32, %v555_v33  ;;  %v558_v35 = vsel %vm556_vm3, %v555_v33, %v553_v32  ;;  %761 = vmatprep.mubr.f32.mxu0 %v1061_v16 }
 0x120   : > { %v570_v38 = vmul.f32 %v563_v30, %v557_v34  ;;  %v571_v39 = vmul.f32 %v567_v31, %v558_v35 }
 0x122   : > { %v572_v40 = vadd.f32 %v570_v38, %v550_v36  ;;  %v573_v41 = vadd.f32 %v571_v39, %v551_v37 }
 0x124   : > { %v578_v42 = vsel %vm577_vm4, %v572_v40, 0.0  ;;  %v579_v19 = vsel %vm577_vm4, %v573_v41, 0.0  ;;  %v583_v43 = vmul.f32 %v572_v40, %v572_v40  ;;  %v584_v44 = vmul.f32 %v573_v41, %v573_v41 }
 0x125   : > { %v580_v22 = vadd.f32 %v579_v19, %v578_v42 }
 0x126   : > { %v585_v23 = vsel %vm577_vm4, %v583_v43, 0.0  ;;  %v586_v45 = vsel %vm577_vm4, %v584_v44, 0.0 }
 0x127   : > { %581 = vadd.xlane.f32.xlu1 %v580_v22  ;;  %v587_v46 = vadd.f32 %v586_v45, %v585_v23 }
 0x129   : > { %588 = vadd.xlane.f32.xlu0 %v587_v46 }
 0x1b0   : > { %v582_v48 = vpop.xlane.xlu1 %581 }
 0x1b1   : > { %v590_v49 = vmul.f32 %v582_v48, %v574_v47 }
 0x1b2   : > { %v589_v50 = vpop.xlane.xlu0 %588 }
 0x1b3   : > { %v592_v51 = vsel %vm591_vm5, %v590_v49, 0.0  ;;  %v600_v52 = vmul.f32 %v589_v50, %v574_v47 }
 0x1b4   : > { %v593_v53 = vrot.slane %v592_v51, 4 }
 0x1b5   : > { %v601_v54 = vsel %vm591_vm5, %v600_v52, 0.0 }
 0x1b6   : > { %v594_v55 = vadd.f32 %v593_v53, %v592_v51  ;;  %v602_v56 = vrot.slane %v601_v54, 4 }
 0x1b8   : > { %v595_v57 = vrot.slane %v594_v55, 2  ;;  %v603_v58 = vadd.f32 %v602_v56, %v601_v54 }
 0x1ba   : > { %v596_v59 = vadd.f32 %v595_v57, %v594_v55  ;;  %v604_v60 = vrot.slane %v603_v58, 2 }
 0x1bc   : > { %v597_v61 = vrot.slane %v596_v59, 1  ;;  %v605_v62 = vadd.f32 %v604_v60, %v603_v58 }
 0x1be   : > { %v598_v63 = vadd.f32 %v597_v61, %v596_v59  ;;  %v606_v0 = vrot.slane %v605_v62, 1  ;;  %v1062_v61 = vmov -1.0  }
 0x1c0   : > { %v599_v1 = vmul.f32 0.0009765625, %v598_v63  ;;  %v607_v2 = vadd.f32 %v606_v0, %v605_v62 }
 0x1c2   : > { %v609_v3 = vmul.f32 %v599_v1, %v599_v1  ;;  %v608_v5 = vmul.f32 0.0009765625, %v607_v2  ;;  %v613_v12 = vmul.f32 %v599_v1, %v574_v47 }
 0x1c4   : > { %v610_v6 = vsub.f32 %v608_v5, %v609_v3 }
 0x1c6   : > { %v611_v7 = vadd.f32 1e-05, %v610_v6 }
 0x1c8   : > { %981 = vrsqrt.f32 %v611_v7 }
 0x1d5   : > { %v982_v8 = vpop.eup %981 }
 0x1d6   : > { %v615_v10 = vmul.f32 %v982_v8, %v574_v47 }
 0x1d8   : > { %v617_v11 = vmul.f32 %v615_v10, %v575_v9  ;;  %v686_v10 = vld [vmem:[%s1315_s6] sm:$0xff] }
 0x1da   : > { %622 = vperm.xlu0 %978, %v617_v11   ;;  %v618_v14 = vmul.f32 %v617_v11, %v613_v12 }
 0x1dc   : > { %v619_v15 = vsub.f32 %v576_v13, %v618_v14 }
 0x1de   : > { %629 = vperm.xlu1 %979, %v619_v15  }
 0x255   : > { %v623_v17 = vpop.permute.xlu0 %622 }
 0x256   : > { %v625_v4 = vmul.f32 %v623_v17, %v572_v40  ;;  %v626_v18 = vmul.f32 %v623_v17, %v573_v41  ;;  %v768_v17 = vld [vmem:[%s1316_s7] sm:$0xff] }
 0x259   : > { %v630_v20 = vpop.permute.xlu1 %629 }
 0x25a   : > { %v632_v21 = vadd.f32 %v630_v20, %v625_v4  ;;  %v633_v24 = vadd.f32 %v630_v20, %v626_v18 }
 0x25c   : > { %v636_v25 = vmul.f32 0.70710677, %v632_v21  ;;  %v637_v26 = vmul.f32 0.70710677, %v633_v24  ;;  %v634_v3 = vmul.f32 0.5, %v632_v21  ;;  %v635_v6 = vmul.f32 0.5, %v633_v24 }
 0x25e   : > { %v642_v27 = vand.u32 2147483647, %v636_v25  ;;  %v643_v28 = vand.u32 2147483647, %v637_v26  ;;  %vm638_vm6 = vcmp.ge.f32.partialorder %v636_v25, 0.0  ;;  %vm639_vm7 = vcmp.ge.f32.partialorder %v637_v26, 0.0 }
 0x25f   : > { %v640_v62 = vsel %vm638_vm6, 1.0, %v1062_v61  ;;  %v641_v0 = vsel %vm639_vm7, 1.0, %v1062_v61 }
 0x260   : > { %v644_v29 = vmul.f32 0.3275911, %v642_v27  ;;  %v645_v30 = vmul.f32 0.3275911, %v643_v28  ;;  %v668_v33 = vsub.f32 0.0, %v642_v27  ;;  %v669_v34 = vsub.f32 0.0, %v643_v28 }
 0x262   : > { %v646_v31 = vadd.f32 1.0, %v644_v29  ;;  %v647_v32 = vadd.f32 1.0, %v645_v30  ;;  %v670_v35 = vmul.f32 %v668_v33, %v642_v27  ;;  %v671_v36 = vmul.f32 %v669_v34, %v643_v28 }
 0x264   : > { %983 = vrcp.f32 %v646_v31  ;;  %v672_v39 = vmul.f32 1.442695, %v670_v35  ;;  %v674_v41 = vmul.f32 1.442695, %v671_v36 }
 0x265   : > { %985 = vrcp.f32 %v647_v32 }
 0x266   : > { %987 = vpow2.f32 %v672_v39 }
 0x267   : > { %989 = vpow2.f32 %v674_v41 }
 0x271   : > { %v984_v37 = vpop.eup %983 }
 0x272   : > { %v986_v38 = vpop.eup %985  ;;  %v650_v40 = vmul.f32 1.0614054, %v984_v37 }
 0x273   : > { %v651_v42 = vmul.f32 1.0614054, %v986_v38  ;;  %v988_v55 = vpop.eup %987 }
 0x274   : > { %v652_v19 = vadd.f32 -1.4531521, %v650_v40  ;;  %v990_v57 = vpop.eup %989 }
 0x275   : > { %v653_v43 = vadd.f32 -1.4531521, %v651_v42 }
 0x276   : > { %v654_v44 = vmul.f32 %v984_v37, %v652_v19 }
 0x277   : > { %v655_v22 = vmul.f32 %v986_v38, %v653_v43 }
 0x278   : > { %v656_v23 = vadd.f32 1.4214138, %v654_v44 }
 0x279   : > { %v657_v45 = vadd.f32 1.4214138, %v655_v22 }
 0x27a   : > { %v658_v46 = vmul.f32 %v984_v37, %v656_v23 }
 0x27b   : > { %v659_v47 = vmul.f32 %v986_v38, %v657_v45  ;;  %v769_v45 = vld [vmem:[%s1317_s8] sm:$0xff] }
 0x27c   : > { %v660_v48 = vadd.f32 -0.28449672, %v658_v46 }
 0x27d   : > { %v661_v49 = vadd.f32 -0.28449672, %v659_v47 }
 0x27e   : > { %v662_v50 = vmul.f32 %v984_v37, %v660_v48 }
 0x27f   : > { %v663_v51 = vmul.f32 %v986_v38, %v661_v49  ;;  %v770_v49 = vld [vmem:[%s1318_s9] sm:$0xff] }
 0x280   : > { %v664_v52 = vadd.f32 0.2548296, %v662_v50 }
 0x281   : > { %v665_v53 = vadd.f32 0.2548296, %v663_v51 }
 0x282   : > { %v666_v54 = vmul.f32 %v984_v37, %v664_v52 }
 0x283   : > { %v667_v56 = vmul.f32 %v986_v38, %v665_v53 }
 0x284   : > { %v676_v58 = vmul.f32 %v988_v55, %v666_v54 }
 0x285   : > { %v677_v59 = vmul.f32 %v990_v57, %v667_v56 }
 0x286   : > { %v678_v60 = vsub.f32 1.0, %v676_v58 }
 0x287   : > { %v679_v63 = vsub.f32 1.0, %v677_v59 }
 0x288   : > { %v680_v1 = vmul.f32 %v678_v60, %v640_v62 }
 0x289   : > { %v681_v2 = vmul.f32 %v679_v63, %v641_v0 }
 0x28a   : > { %v682_v5 = vadd.f32 1.0, %v680_v1 }
 0x28b   : > { %v683_v7 = vadd.f32 1.0, %v681_v2 }
 0x28c   : > { %v684_v8 = vmul.f32 %v682_v5, %v634_v3 }
 0x28d   : > { %v685_v9 = vmul.f32 %v683_v7, %v635_v6 }
 0x28f   : > { %921 = vmatprep.subr.msk.mxu0 %vm577_vm4, %v685_v9 }
 0x290   : > { %922 = vmatpush1.msk.msra.mxu0 %vm577_vm4, %v684_v8 }
 0x291   : > { %923 = vmatmul.mubr.msk.f32.vlgmr.msra.gmra.mxu0 %vm687_vm8, %v686_v10 }
 0x351   : > { %v763_v11 = vpop.f32.mrf.mxu0 }
 0x352   : > { %v774_v15 = vmul.f32 %v763_v11, %v763_v11 }
 0x353   : > { %v765_v12 = vpop.f32.mrf.mxu0 }
 0x354   : > { %v775_v13 = vmul.f32 %v765_v12, %v765_v12  ;;  %v771_v14 = vadd.f32 %v765_v12, %v763_v11 }
 0x356   : > { %772 = vadd.xlane.f32.xlu1 %v771_v14  ;;  %v776_v16 = vadd.f32 %v775_v13, %v774_v15 }
 0x358   : > { %777 = vadd.xlane.f32.xlu0 %v776_v16 }
 0x3df   : > { %v773_v4 = vpop.xlane.xlu1 %772 }
 0x3e0   : > { %v779_v18 = vmul.f32 %v773_v4, %v768_v17 }
 0x3e1   : > { %v778_v20 = vpop.xlane.xlu0 %777 }
 0x3e2   : > { %v781_v21 = vsel %vm780_vm9, %v779_v18, 0.0  ;;  %v789_v24 = vmul.f32 %v778_v20, %v768_v17 }
 0x3e3   : > { %v782_v25 = vrot.slane %v781_v21, 4 }
 0x3e4   : > { %v790_v26 = vsel %vm780_vm9, %v789_v24, 0.0 }
 0x3e5   : > { %v783_v27 = vadd.f32 %v782_v25, %v781_v21  ;;  %v791_v28 = vrot.slane %v790_v26, 4 }
 0x3e7   : > { %v784_v29 = vrot.slane %v783_v27, 2  ;;  %v792_v30 = vadd.f32 %v791_v28, %v790_v26 }
 0x3e9   : > { %v785_v31 = vadd.f32 %v784_v29, %v783_v27  ;;  %v793_v32 = vrot.slane %v792_v30, 2 }
 0x3eb   : > { %v794_v33 = vadd.f32 %v793_v32, %v792_v30  ;;  %v786_v34 = vrot.slane %v785_v31, 1 }
 0x3ed   : > { %v795_v35 = vrot.slane %v794_v33, 1  ;;  %v787_v36 = vadd.f32 %v786_v34, %v785_v31 }
 0x3ef   : > { %v796_v37 = vadd.f32 %v795_v35, %v794_v33  ;;  %v788_v38 = vmul.f32 0.0009765625, %v787_v36 }
 0x3f1   : > { %v797_v39 = vmul.f32 0.0009765625, %v796_v37  ;;  %v802_v40 = vmul.f32 %v788_v38, %v768_v17  ;;  %v798_v41 = vmul.f32 %v788_v38, %v788_v38 }
 0x3f3   : > { %v803_v42 = vsel %vm780_vm9, %v802_v40, 0.0  ;;  %v799_v19 = vsub.f32 %v797_v39, %v798_v41 }
 0x3f4   : > { %804 = vadd.xlane.f32.xlu1 %v803_v42 }
 0x3f5   : > { %v800_v43 = vadd.f32 1e-05, %v799_v19 }
 0x3f7   : > { %991 = vrsqrt.f32 %v800_v43 }
 0x404   : > { %v992_v44 = vpop.eup %991 }
 0x405   : > { %v806_v22 = vmul.f32 %v992_v44, %v768_v17 }
 0x407   : > { %v807_v23 = vsel %vm780_vm9, %v806_v22, 0.0 }
 0x408   : > { %808 = vadd.xlane.f32.xlu0 %v807_v23 }
 0x47d   : > { %v805_v48 = vpop.xlane.xlu1 %804 }
 0x491   : > { %v809_v46 = vpop.xlane.xlu0 %808 }
 0x492   : > { %v810_v47 = vmul.f32 %v809_v46, %v769_v45 }
 0x494   : > { %v811_v50 = vmul.f32 %v810_v47, %v805_v48  ;;  %815 = vperm.xlu0 %978, %v810_v47  }
 0x496   : > { %v812_v51 = vsub.f32 %v770_v49, %v811_v50 }
 0x498   : > { %822 = vperm.xlu1 %979, %v812_v51  }
 0x50f   : > { %v816_v52 = vpop.permute.xlu0 %815 }
 0x510   : > { %v818_v53 = vmul.f32 %v816_v52, %v763_v11  ;;  %v819_v54 = vmul.f32 %v816_v52, %v765_v12 }
 0x513   : > { %v823_v55 = vpop.permute.xlu1 %822 }
 0x514   : > { %v825_v56 = vadd.f32 %v823_v55, %v818_v53  ;;  %v826_v57 = vadd.f32 %v823_v55, %v819_v54 }
 0x516   : > { %827 = vst [vmem:[%s352_s18] sm:$0xff] %v825_v56  ;;  %828 = vst [vmem:[%s352_s18 + $0x8] sm:$0xff] %v826_v57 }
 0x517   : > { %1006 = shalt.err (!%p1003_p3)
}
 0x518   : > { %s1007_s12 = scalar_lea.hbm %s1274_s26, 256  ;;  %s1011_s21 = scalar_lea.hbm %s1319_s10, 512 }
 0x519   : > { %p1008_p4 = scmp.ne.s32.totalorder %s1274_s26, %s1007_s12  ;;  %p1012_p9 = scmp.lt.s32.totalorder %s1274_s26, %s1319_s10 }
 0x51a   : > { %p1013_p10 = scmp.lt.s32.totalorder %s1011_s21, %s1007_s12 }
 0x51b   : > { %p1009_p7 = pnand %p1008_p4, %p1157_p5 }
 0x51c   : > { %p1014_p11 = por %p1013_p10, %p1012_p9 }
 0x51d   : > { %p1010_p8 = pneg %p1009_p7 }
 0x51f   : > { %p1015_p12 = pnand %p1014_p11, %p1010_p8 }
 0x521   : > { %1018 = shalt.err (!%p1015_p12)
}
 0x522   : > { %931 = dma.vmem_to_hbm [thread:$0]  (%p1157_p5), %s845_s20, 256, %s1274_s26, %s830_s27  }
 0x523 PF: > { %p937_p13 = scmp.ge.s32.totalorder %s1053_s16, 2  ;;  %s856_s28 = sand.u32 1, %s1041_s13  }
 0x524   : > { %s857_s29 = scalar_lea.sflag [#allocation3], %s856_s28 }
 0x525   : > { %p934_p0 = pnand %p937_p13, %p1161_p6 }
 0x527   : > { %p935_p1 = pneg %p934_p0 }
 0x529   : > { %1036 = dma.done.wait (%p935_p1), %s857_s29, 256  }
 0x52a   : > { %1038 = vsyncadd (%p935_p1), %s857_s29, 4294967040  ;;  %p20_p2 = scmp.ge.s32.totalorder %s1144_s19, 4   ;;  %s1322_s13 = smov %s1045_s14 }
 0x52b   : > { %s1323_s14 = smov %s1049_s15  ;;  %s1324_s15 = smov %s1155_s22 }
 0x52c   : > { %s1325_s16 = smov %s1144_s19  ;;  %22 = sbr.rel (!%p20_p2) target bundleno = 3 (0x3), region = 106 }
 0x531   :  { %862 = vsyncpa [#allocation3], 1 }
 0x532   :  { %864 = vsyncpa [#allocation3 + $0x1], 1 }

</bundles_post_ra>
